<compile_context>
chip_gen: v6e
topology: v6e:2x2x1
jax: 0.10.0
libtpu: 0.0.40
codegen_flags: <defaults>
</compile_context>

<pallas_src>
import functools

import jax
import jax.numpy as jnp
from jax.experimental import pallas as pl
from jax.experimental.pallas import tpu as pltpu

_LANES = 128
_SMOOTH = 0.0001


def _chip_config():
    """Per-chip tuning: (#TensorCore splits, target bytes per input block, vmem limit)."""
    try:
        kind = jax.devices()[0].device_kind.lower()
    except Exception:  # No device info available -> conservative defaults.
        kind = ""
    if "v7" in kind:
        # v7x: 2 TCs/chip, ~3.2 TB/s HBM.  8 MiB blocks amortize per-step
        # overhead; 2 inputs x 2 buffers x 8 MiB = 32 MiB, so raise scoped VMEM
        # (64 MiB physical) explicitly.
        return 2, 8 << 20, 44 << 20
    if "v6" in kind:
        # v6e: 1 TC, 32 MiB default scoped VMEM; 4 MiB blocks (16 MiB buffered).
        return 1, 4 << 20, None
    # v5e and unknown chips: 2 MiB blocks fit the 16 MiB default scoped VMEM.
    return 1, 2 << 20, None


_NUM_TC, _BLOCK_BYTES, _VMEM_LIMIT = _chip_config()


def _dice_partials_kernel(p_ref, t_ref, out_ref, *, block_rows, valid_rows,
                          blocks_per_split, need_mask):
    """Accumulates per-lane partials (sum p*t, sum p, sum t) into out_ref (3, 128)."""
    s = pl.program_id(0)   # split (TensorCore shard on v7x)
    j = pl.program_id(1)   # sequential block within this split

    @pl.when(j == 0)
    def _():
        out_ref[...] = jnp.zeros_like(out_ref)

    def accumulate(mask_rows):
        # Cast inside the kernel (VPU work hidden under the DMA) so the wrapper
        # never materializes a widened copy of sub-f32 inputs in HBM.
        p = p_ref[...].astype(jnp.float32)
        t = t_ref[...].astype(jnp.float32)
        if mask_rows:
            # Ragged / fully-out-of-range blocks: zero rows past the true row
            # count so garbage (or clamped duplicate data) never reaches sums.
            block_idx = s * blocks_per_split + j
            row = jax.lax.broadcasted_iota(jnp.int32, p.shape, 0)
            ok = (block_idx * block_rows + row) < valid_rows
            p = jnp.where(ok, p, 0.0)
            t = jnp.where(ok, t, 0.0)
        pt = jnp.sum(p * t, axis=0, keepdims=True)
        ps = jnp.sum(p, axis=0, keepdims=True)
        ts = jnp.sum(t, axis=0, keepdims=True)
        # Single fused (3, 128) read-modify-write instead of three sub-vreg RMWs.
        out_ref[...] += jnp.concatenate([pt, ps, ts], axis=0)

    if need_mask:
        # Only blocks that straddle / exceed valid_rows pay for the mask.
        block_end = (s * blocks_per_split + j + 1) * block_rows
        straddles = block_end > valid_rows

        @pl.when(jnp.logical_not(straddles))
        def _():
            accumulate(False)

        @pl.when(straddles)
        def _():
            accumulate(True)
    else:
        accumulate(False)


def _lane_partials(p2d, t2d, rows):
    """Runs the streaming kernel over a (rows, 128) slab; returns (3,) f32 sums."""
    itemsize = max(jnp.dtype(p2d.dtype).itemsize, jnp.dtype(t2d.dtype).itemsize)
    # Size blocks by bytes (dtype-aware), rounded to a multiple of 8 rows.
    target_rows = max(8, (_BLOCK_BYTES // (_LANES * itemsize)) // 8 * 8)
    block_rows = min(target_rows, rows)   # full extent if rows < target (ok per (8,128) rule)
    num_blocks = pl.cdiv(rows, block_rows)
    n_split = min(_NUM_TC, num_blocks)
    blocks_per_split = pl.cdiv(num_blocks, n_split)
    # Masking is needed whenever the logical grid covers more rows than exist
    # (ragged final block and/or an extra fully-out-of-range duplicate block).
    need_mask = (n_split * blocks_per_split * block_rows) != rows
    last_block = num_blocks - 1

    def in_index_map(s, j):
        # Clamp so the DMA never walks past the last block; logically
        # out-of-range duplicate data is masked to zero in-kernel.
        return (jnp.minimum(s * blocks_per_split + j, last_block), 0)

    kernel = functools.partial(
        _dice_partials_kernel,
        block_rows=block_rows,
        valid_rows=rows,
        blocks_per_split=blocks_per_split,
        need_mask=need_mask,
    )

    if n_split > 1:
        # v7x only: shard the split axis across the 2 TensorCores.
        core_parallel = getattr(pltpu, "CORE_PARALLEL", "parallel")
        dims = (core_parallel, pltpu.ARBITRARY)
    else:
        dims = ("arbitrary", "arbitrary")

    compiler_kwargs = dict(dimension_semantics=dims)
    if _VMEM_LIMIT is not None:
        compiler_kwargs["vmem_limit_bytes"] = _VMEM_LIMIT

    partials = pl.pallas_call(
        kernel,
        out_shape=jax.ShapeDtypeStruct((n_split, 3, _LANES), jnp.float32),
        grid_spec=pltpu.PrefetchScalarGridSpec(
            num_scalar_prefetch=0,
            grid=(n_split, blocks_per_split),
            in_specs=[
                pl.BlockSpec((block_rows, _LANES), in_index_map),
                pl.BlockSpec((block_rows, _LANES), in_index_map),
            ],
            out_specs=pl.BlockSpec((None, 3, _LANES), lambda s, j: (s, 0, 0)),
        ),
        compiler_params=pltpu.CompilerParams(**compiler_kwargs),
    )(p2d, t2d)

    # Tiny epilogue: combine per-split, per-lane partials.
    return jnp.sum(partials, axis=(0, 2))   # (3,)


@jax.jit
def dice_loss(prediction, target):
    assert prediction.shape == target.shape, "prediction/target shape mismatch"

    p_flat = prediction.reshape(-1)
    t_flat = target.reshape(-1)
    n = p_flat.shape[0]
    smooth = jnp.float32(_SMOOTH)

    if n == 0:
        # Empty input: all sums are zero -> dice = smooth/smooth = 1, loss = 0.
        return jnp.float32(0.0)

    rows = n // _LANES
    tail = n - rows * _LANES

    sums = jnp.zeros((3,), jnp.float32)
    if rows > 0:
        main = rows * _LANES
        if tail:
            # Prefix slice keeps the main slab lane-dense without a full-tensor
            # zero-pad pass (tail handled below).
            # TODO(synk): a 1-D BlockSpec with an in-kernel element mask would
            # avoid even this slice copy for non-128-aligned element counts.
            p_main = p_flat[:main]
            t_main = t_flat[:main]
        else:
            p_main = p_flat   # metadata-only reshape; no extra HBM pass
            t_main = t_flat
        sums = sums + _lane_partials(p_main.reshape(rows, _LANES),
                                     t_main.reshape(rows, _LANES), rows)

    if tail:
        # <128-element remainder: negligible, reduced directly in the wrapper.
        p_tail = p_flat[rows * _LANES:].astype(jnp.float32)
        t_tail = t_flat[rows * _LANES:].astype(jnp.float32)
        sums = sums + jnp.stack(
            [jnp.sum(p_tail * t_tail), jnp.sum(p_tail), jnp.sum(t_tail)])

    intersection = sums[0]
    union = sums[1] + sums[2]
    dice_coefficient = (2.0 * intersection + smooth) / (union + smooth)
    return 1.0 - dice_coefficient


def dice_loss_ref(prediction, target):
    smooth = 0.0001
    p = prediction.astype(jnp.float32)
    t = target.astype(jnp.float32)
    intersection = jnp.sum(p * t)
    union = jnp.sum(p) + jnp.sum(t)
    dice_coefficient = (2.0 * intersection + smooth) / (union + smooth)
    return 1.0 - dice_coefficient


if __name__ == "__main__":
    key = jax.random.PRNGKey(0)
    k1, k2, k3, k4, k5, k6 = jax.random.split(key, 6)

    # 1) NCHW segmentation-style prediction/target, lane-aligned element count.
    shape = (2, 4, 16, 16)
    prediction = jax.nn.sigmoid(jax.random.normal(k1, shape, dtype=jnp.float32))
    target = (jax.random.uniform(k2, shape) > 0.5).astype(jnp.float32)
    out = jax.block_until_ready(dice_loss(prediction, target))
    ref = dice_loss_ref(prediction, target)
    assert jnp.allclose(out, ref, rtol=1e-5, atol=1e-6), (out, ref)

    # 2) Element count not a multiple of 128: exercises the no-pad tail path.
    shape2 = (2, 3, 10, 10)
    prediction2 = jax.nn.sigmoid(jax.random.normal(k3, shape2, dtype=jnp.float32))
    target2 = (jax.random.uniform(k4, shape2) > 0.5).astype(jnp.float32)
    out2 = jax.block_until_ready(dice_loss(prediction2, target2))
    ref2 = dice_loss_ref(prediction2, target2)
    assert jnp.allclose(out2, ref2, rtol=1e-5, atol=1e-6), (out2, ref2)

    # 3) Medium tensor: exercises the multi-block grid + masked ragged block.
    shape3 = (4, 1, 768, 768)
    prediction3 = jax.nn.sigmoid(jax.random.normal(k5, shape3, dtype=jnp.float32))
    target3 = (jax.random.uniform(k6, shape3) > 0.5).astype(jnp.float32)
    out3 = jax.block_until_ready(dice_loss(prediction3, target3))
    ref3 = dice_loss_ref(prediction3, target3)
    assert jnp.allclose(out3, ref3, rtol=1e-4, atol=1e-5), (out3, ref3)

    print("KERNEL_OK")
</pallas_src>

<mosaic_0001>
module attributes {stable_mosaic.version = 11 : i64} {
  func.func @_dice_partials_kernel(%arg0: i32, %arg1: i32, %arg2: memref<16x128xf32, #tpu.memory_space<vmem>>, %arg3: memref<16x128xf32, #tpu.memory_space<vmem>>, %arg4: memref<1x3x128xf32, #tpu.memory_space<vmem>>) attributes {dimension_semantics = [#tpu.dimension_semantics<arbitrary>, #tpu.dimension_semantics<arbitrary>], iteration_bounds = array<i64: 1, 1>, scalar_prefetch = 0 : i64, scratch_operands = 0 : i64, tpu.core_type = #tpu.core_type<tc>, window_params = [{transform_indices = @transform_0, window_bounds = array<i64: 16, 128>}, {transform_indices = @transform_1, window_bounds = array<i64: 16, 128>}, {transform_indices = @transform_2, window_bounds = array<i64: 1, 3, 128>}]} {
    %c0_i32 = arith.constant 0 : i32
    %0 = arith.cmpi eq, %arg1, %c0_i32 : i32
    %1 = arith.extui %0 : i1 to i32
    %c0_i32_0 = arith.constant 0 : i32
    %2 = arith.cmpi ne, %1, %c0_i32_0 : i32
    scf.if %2 {
      %cst_12 = arith.constant 0.000000e+00 : f32
      %19 = vector.broadcast %cst_12 : f32 to vector<3x128xf32>
      %c0_13 = arith.constant 0 : index
      %c0_14 = arith.constant 0 : index
      %c0_15 = arith.constant 0 : index
      %20 = vector.load %arg4[%c0_13, %c0_14, %c0_15] : memref<1x3x128xf32, #tpu.memory_space<vmem>>, vector<1x3x128xf32>
      %21 = vector.shape_cast %20 : vector<1x3x128xf32> to vector<3x128xf32>
      %22 = vector.shape_cast %19 : vector<3x128xf32> to vector<1x3x128xf32>
      tpu.vector_store %arg4[%c0_13, %c0_14, %c0_15], %22 {strides = array<i32>} : memref<1x3x128xf32, #tpu.memory_space<vmem>>, vector<1x3x128xf32>,
    } else {
    }
    %c0 = arith.constant 0 : index
    %c0_1 = arith.constant 0 : index
    %3 = vector.load %arg2[%c0, %c0_1] : memref<16x128xf32, #tpu.memory_space<vmem>>, vector<16x128xf32>
    %c0_2 = arith.constant 0 : index
    %c0_3 = arith.constant 0 : index
    %4 = vector.load %arg3[%c0_2, %c0_3] : memref<16x128xf32, #tpu.memory_space<vmem>>, vector<16x128xf32>
    %5 = arith.mulf %3, %4 : vector<16x128xf32>
    %cst = arith.constant dense<0.000000e+00> : vector<128xf32>
    %6 = vector.multi_reduction <add>, %5, %cst [0] : vector<16x128xf32> to vector<128xf32>
    %7 = vector.shape_cast %6 : vector<128xf32> to vector<1x128xf32>
    %cst_4 = arith.constant dense<0.000000e+00> : vector<128xf32>
    %8 = vector.multi_reduction <add>, %3, %cst_4 [0] : vector<16x128xf32> to vector<128xf32>
    %9 = vector.shape_cast %8 : vector<128xf32> to vector<1x128xf32>
    %cst_5 = arith.constant dense<0.000000e+00> : vector<128xf32>
    %10 = vector.multi_reduction <add>, %4, %cst_5 [0] : vector<16x128xf32> to vector<128xf32>
    %11 = vector.shape_cast %10 : vector<128xf32> to vector<1x128xf32>
    %c0_6 = arith.constant 0 : index
    %c0_7 = arith.constant 0 : index
    %c0_8 = arith.constant 0 : index
    %12 = vector.load %arg4[%c0_6, %c0_7, %c0_8] : memref<1x3x128xf32, #tpu.memory_space<vmem>>, vector<1x3x128xf32>
    %13 = vector.shape_cast %12 : vector<1x3x128xf32> to vector<3x128xf32>
    %14 = tpu.concatenate %7, %9, %11 in 0 : vector<1x128xf32>, vector<1x128xf32>, vector<1x128xf32> -> vector<3x128xf32>
    %15 = arith.addf %13, %14 : vector<3x128xf32>
    %c0_9 = arith.constant 0 : index
    %c0_10 = arith.constant 0 : index
    %c0_11 = arith.constant 0 : index
    %16 = vector.load %arg4[%c0_9, %c0_10, %c0_11] : memref<1x3x128xf32, #tpu.memory_space<vmem>>, vector<1x3x128xf32>
    %17 = vector.shape_cast %16 : vector<1x3x128xf32> to vector<3x128xf32>
    %18 = vector.shape_cast %15 : vector<3x128xf32> to vector<1x3x128xf32>
    tpu.vector_store %arg4[%c0_9, %c0_10, %c0_11], %18 {strides = array<i32>} : memref<1x3x128xf32, #tpu.memory_space<vmem>>, vector<1x3x128xf32>,
    return
  }
  func.func @transform_0(%arg0: i32, %arg1: i32) -> (i32, i32) {
    %c1_i32 = arith.constant 1 : i32
    %0 = arith.muli %arg0, %c1_i32 : i32
    %1 = arith.addi %0, %arg1 : i32
    %c0_i32 = arith.constant 0 : i32
    %2 = arith.minsi %1, %c0_i32 : i32
    %c0_i32_0 = arith.constant 0 : i32
    %c0_i32_1 = arith.constant 0 : i32
    return %2, %c0_i32_0 : i32, i32
  }
  func.func @transform_1(%arg0: i32, %arg1: i32) -> (i32, i32) {
    %c1_i32 = arith.constant 1 : i32
    %0 = arith.muli %arg0, %c1_i32 : i32
    %1 = arith.addi %0, %arg1 : i32
    %c0_i32 = arith.constant 0 : i32
    %2 = arith.minsi %1, %c0_i32 : i32
    %c0_i32_0 = arith.constant 0 : i32
    %c0_i32_1 = arith.constant 0 : i32
    return %2, %c0_i32_0 : i32, i32
  }
  func.func @transform_2(%arg0: i32, %arg1: i32) -> (i32, i32, i32) {
    %c0_i32 = arith.constant 0 : i32
    %c0_i32_0 = arith.constant 0 : i32
    %c0_i32_1 = arith.constant 0 : i32
    return %arg0, %c0_i32, %c0_i32_0 : i32, i32, i32
  }
}

</mosaic_0001>

<bundles_post_ra>
// kernel: dice_loss.1
= control target key start
LH: loop header
LB: loop body
LE: loop exit
PB: predicated region body
PF: predicated region fallthrough
CT: control target
= control target key end

     0   :  { %v131_v0 = vmov 0.0   ;;  %vm108_vm0 = vcmask 1040384   ;;  %vm110_vm1 = vcmask 1041408   ;;  %s168_s2 = inlined_call_operand.vmem [shape: f32[1,3,128], index: 2, kind: output, shape index: {}]   ;;  %s169_s0 = inlined_call_operand.vmem [shape: f32[16,128], index: 0, kind: input, shape index: {}]   ;;  %s170_s1 = inlined_call_operand.vmem [shape: f32[16,128], index: 1, kind: input, shape index: {}]  }
   0x1   :  { %79 = vst [vmem:[%s168_s2] sm:$0x7] %v131_v0  ;;  %v80_v1 = vld [vmem:[%s169_s0] sm:$0xff]  ;;  %v81_v2 = vld [vmem:[%s169_s0 + $0x8] sm:$0xff] }
   0x2   :  { %v82_v3 = vld [vmem:[%s170_s1] sm:$0xff]  ;;  %v83_v4 = vld [vmem:[%s170_s1 + $0x8] sm:$0xff]  ;;  %v93_v6 = vadd.f32 %v81_v2, %v80_v1 }
   0x3   :  { %v84_v5 = vmul.f32 %v82_v3, %v80_v1  ;;  %v85_v7 = vmul.f32 %v83_v4, %v81_v2  ;;  %v100_v8 = vadd.f32 %v83_v4, %v82_v3 }
   0x4   :  { %v94_v9 = vrot.slane %v93_v6, 4 }
   0x5   :  { %v86_v10 = vadd.f32 %v85_v7, %v84_v5  ;;  %v101_v11 = vrot.slane %v100_v8, 4 }
   0x6   :  { %v95_v12 = vadd.f32 %v94_v9, %v93_v6 }
   0x7   :  { %v87_v13 = vrot.slane %v86_v10, 4  ;;  %v102_v14 = vadd.f32 %v101_v11, %v100_v8 }
   0x8   :  { %v96_v15 = vrot.slane %v95_v12, 2  ;;  %v107_v28 = vld [vmem:[%s168_s2] sm:$0x7] }
   0x9   :  { %v88_v16 = vadd.f32 %v87_v13, %v86_v10  ;;  %v103_v17 = vrot.slane %v102_v14, 2 }
   0xa   :  { %v97_v18 = vadd.f32 %v96_v15, %v95_v12 }
   0xb   :  { %v89_v19 = vrot.slane %v88_v16, 2  ;;  %v104_v20 = vadd.f32 %v103_v17, %v102_v14 }
   0xc   :  { %v98_v21 = vrot.slane %v97_v18, 1 }
   0xd   :  { %v90_v22 = vadd.f32 %v89_v19, %v88_v16  ;;  %v105_v23 = vrot.slane %v104_v20, 1 }
   0xe   :  { %v99_v25 = vadd.f32 %v98_v21, %v97_v18 }
   0xf   :  { %v91_v24 = vrot.slane %v90_v22, 1  ;;  %v106_v26 = vadd.f32 %v105_v23, %v104_v20 }
  0x11   :  { %v92_v27 = vadd.f32 %v91_v24, %v90_v22 }
  0x13   :  { %v109_v29 = vsel %vm108_vm0, %v92_v27, %v99_v25 }
  0x14   :  { %v111_v30 = vsel %vm110_vm1, %v109_v29, %v106_v26 }
  0x15   :  { %v112_v31 = vadd.f32 %v111_v30, %v107_v28 }
  0x17   :  { %113 = vst [vmem:[%s168_s2] sm:$0x7] %v112_v31 }

</bundles_post_ra>
